<compile_context>
chip_gen: v7x
topology: tpu7x:2x2x1
jax: 0.10.0
libtpu: 0.0.40
codegen_flags: <defaults>
</compile_context>

<pallas_src>
import functools

import jax
import jax.numpy as jnp
from jax.experimental import pallas as pl
from jax.experimental.pallas import tpu as pltpu


def _round_up(n, m):
    return ((n + m - 1) // m) * m


def _mlp_kernel(x_ref, w1_ref, b1_ref, w2_ref, b2_ref, w34_ref, b34_ref,
                out_ref):
    # fc1 + relu : (TB, D)bf16 @ (D, 128)bf16 -> f32
    h1 = jnp.dot(x_ref[...], w1_ref[...], preferred_element_type=jnp.float32)
    h1 = jnp.maximum(h1 + b1_ref[...], 0.0)

    # fc2 + relu : (TB, 128)bf16 @ (128, 64)bf16 -> f32
    h2 = jnp.dot(h1.astype(jnp.bfloat16), w2_ref[...],
                 preferred_element_type=jnp.float32)
    h2 = jnp.maximum(h2 + b2_ref[...], 0.0)

    # fused heads: (TB, 64)bf16 @ (64, 2)bf16 -> (TB, 2) f32
    z = jnp.dot(h2.astype(jnp.bfloat16), w34_ref[...],
                preferred_element_type=jnp.float32) + b34_ref[...]

    # column 0 = rating (identity), column 1 = sentiment (sigmoid)
    col = jax.lax.broadcasted_iota(jnp.int32, z.shape, 1)
    out_ref[...] = jnp.where(col == 0, z, jax.nn.sigmoid(z))


@functools.partial(jax.jit, static_argnames=("block_b",))
def sentiment_rating_forward(x, params, *, block_b=512):
    """x: (B, input_dim) f32.  Returns (rating (B,1) f32, sentiment (B,1) f32)."""
    B, D = x.shape

    # Batch tile: multiple of 8 sublanes, capped by block_b; pad B to multiple.
    TB = min(block_b, _round_up(max(B, 1), 8))
    B_pad = _round_up(B, TB)

    x_bf = x.astype(jnp.bfloat16)
    if B_pad != B:
        x_bf = jnp.pad(x_bf, ((0, B_pad - B), (0, 0)))

    # bf16 weights for the MXU; biases stay f32 (VPU/EUP epilogue in f32).
    w1 = params["w1"].astype(jnp.bfloat16)
    w2 = params["w2"].astype(jnp.bfloat16)
    w34 = jnp.concatenate([params["w3"], params["w4"]], axis=1).astype(jnp.bfloat16)
    b1 = params["b1"]
    b2 = params["b2"]
    b34 = jnp.concatenate([params["b3"], params["b4"]], axis=1)

    grid = (B_pad // TB,)
    moving = lambda i: (i, 0)      # x / output tiles walk the batch
    resident = lambda i: (0, 0)    # weights & biases stay put in VMEM

    flops = 2 * B_pad * (D * 128 + 128 * 64 + 64 * 2)
    bytes_accessed = (
        B_pad * (D * 2 + 2 * 4)                       # x (bf16) + out (f32)
        + (D * 128 + 128 * 64 + 64 * 2) * 2           # bf16 weights
        + (128 + 64 + 2) * 4                          # f32 biases
    )

    out = pl.pallas_call(
        _mlp_kernel,
        out_shape=jax.ShapeDtypeStruct((B_pad, 2), jnp.float32),
        grid=grid,
        in_specs=[
            pl.BlockSpec((TB, D), moving),       # x
            pl.BlockSpec((D, 128), resident),    # w1
            pl.BlockSpec((1, 128), resident),    # b1
            pl.BlockSpec((128, 64), resident),   # w2
            pl.BlockSpec((1, 64), resident),     # b2
            pl.BlockSpec((64, 2), resident),     # fused w3|w4
            pl.BlockSpec((1, 2), resident),      # fused b3|b4
        ],
        out_specs=pl.BlockSpec((TB, 2), moving),
        compiler_params=pltpu.CompilerParams(
            dimension_semantics=("parallel",)),
        cost_estimate=pl.CostEstimate(
            flops=flops,
            transcendentals=2 * B_pad,
            bytes_accessed=bytes_accessed),
    )(x_bf, w1, b1, w2, b2, w34, b34)

    rating = out[:B, 0:1]
    sentiment = out[:B, 1:2]
    return rating, sentiment


def init_params(key, input_dim):
    """Deterministic init mirroring PyTorch Linear shapes (stored as (in, out))."""
    ks = jax.random.split(key, 8)

    def uinit(k, shape, fan_in):
        bound = 1.0 / jnp.sqrt(float(fan_in))
        return jax.random.uniform(k, shape, jnp.float32, -bound, bound)

    return {
        "w1": uinit(ks[0], (input_dim, 128), input_dim),
        "b1": uinit(ks[1], (1, 128), input_dim),
        "w2": uinit(ks[2], (128, 64), 128),
        "b2": uinit(ks[3], (1, 64), 128),
        "w3": uinit(ks[4], (64, 1), 64),
        "b3": uinit(ks[5], (1, 1), 64),
        "w4": uinit(ks[6], (64, 1), 64),
        "b4": uinit(ks[7], (1, 1), 64),
    }


def _reference_f32(x, p):
    h1 = jnp.maximum(x @ p["w1"] + p["b1"], 0.0)
    h2 = jnp.maximum(h1 @ p["w2"] + p["b2"], 0.0)
    rating = h2 @ p["w3"] + p["b3"]
    sentiment = jax.nn.sigmoid(h2 @ p["w4"] + p["b4"])
    return rating, sentiment


def _reference_bf16(x, p):
    """Mirrors the kernel's bf16-operand / f32-accumulate matmuls."""
    bf = jnp.bfloat16
    h1 = jnp.dot(x.astype(bf), p["w1"].astype(bf),
                 preferred_element_type=jnp.float32) + p["b1"]
    h1 = jnp.maximum(h1, 0.0)
    h2 = jnp.dot(h1.astype(bf), p["w2"].astype(bf),
                 preferred_element_type=jnp.float32) + p["b2"]
    h2 = jnp.maximum(h2, 0.0)
    rating = jnp.dot(h2.astype(bf), p["w3"].astype(bf),
                     preferred_element_type=jnp.float32) + p["b3"]
    sentiment = jax.nn.sigmoid(
        jnp.dot(h2.astype(bf), p["w4"].astype(bf),
                preferred_element_type=jnp.float32) + p["b4"])
    return rating, sentiment


def _check(x, params, block_b):
    rating, sentiment = sentiment_rating_forward(x, params, block_b=block_b)
    jax.block_until_ready((rating, sentiment))

    B = x.shape[0]
    assert rating.shape == (B, 1) and sentiment.shape == (B, 1)

    # Exact-path check vs a reference with identical bf16 matmul casts.
    ref_r, ref_s = _reference_bf16(x, params)
    assert jnp.allclose(rating, ref_r, atol=1e-4, rtol=1e-4)
    assert jnp.allclose(sentiment, ref_s, atol=1e-4, rtol=1e-4)

    # Semantic check vs the full-f32 PyTorch-equivalent reference
    # (loose tolerance accounts for bf16 MXU operands).
    f32_r, f32_s = _reference_f32(x, params)
    assert jnp.allclose(rating, f32_r, atol=5e-2, rtol=5e-2)
    assert jnp.allclose(sentiment, f32_s, atol=5e-2, rtol=5e-2)


if __name__ == "__main__":
    key = jax.random.PRNGKey(0)
    k_x, k_x2, k_p = jax.random.split(key, 3)

    batch, input_dim = 2, 32
    params = init_params(k_p, input_dim)

    # Small case (B < tile): exercises the pad-to-8-sublanes path.
    x_small = jax.random.normal(k_x, (batch, input_dim), jnp.float32)
    _check(x_small, params, block_b=512)

    # Multi-step grid case with a ragged tail (B=260, TB=128 -> grid of 3,
    # padded to 384): exercises the tiled/pipelined path.
    x_big = jax.random.normal(k_x2, (260, input_dim), jnp.float32)
    _check(x_big, params, block_b=128)

    print("KERNEL_OK")
</pallas_src>

<mosaic_0001>
module attributes {stable_mosaic.version = 11 : i64} {
  func.func @_mlp_kernel(%arg0: i32, %arg1: memref<8x32xbf16, #tpu.memory_space<vmem>>, %arg2: memref<32x128xbf16, #tpu.memory_space<vmem>>, %arg3: memref<1x128xf32, #tpu.memory_space<vmem>>, %arg4: memref<128x64xbf16, #tpu.memory_space<vmem>>, %arg5: memref<1x64xf32, #tpu.memory_space<vmem>>, %arg6: memref<64x2xbf16, #tpu.memory_space<vmem>>, %arg7: memref<1x2xf32, #tpu.memory_space<vmem>>, %arg8: memref<8x2xf32, #tpu.memory_space<vmem>>) attributes {dimension_semantics = [#tpu.dimension_semantics<parallel>], iteration_bounds = array<i64: 1>, scalar_prefetch = 0 : i64, scratch_operands = 0 : i64, tpu.core_type = #tpu.core_type<tc>, window_params = [{transform_indices = @transform_0, window_bounds = array<i64: 8, 32>}, {pipeline_mode = #tpu.pipeline_mode<synchronous>, transform_indices = @transform_1, window_bounds = array<i64: 32, 128>}, {pipeline_mode = #tpu.pipeline_mode<synchronous>, transform_indices = @transform_2, window_bounds = array<i64: 1, 128>}, {pipeline_mode = #tpu.pipeline_mode<synchronous>, transform_indices = @transform_3, window_bounds = array<i64: 128, 64>}, {pipeline_mode = #tpu.pipeline_mode<synchronous>, transform_indices = @transform_4, window_bounds = array<i64: 1, 64>}, {pipeline_mode = #tpu.pipeline_mode<synchronous>, transform_indices = @transform_5, window_bounds = array<i64: 64, 2>}, {pipeline_mode = #tpu.pipeline_mode<synchronous>, transform_indices = @transform_6, window_bounds = array<i64: 1, 2>}, {transform_indices = @transform_7, window_bounds = array<i64: 8, 2>}]} {
    %c0 = arith.constant 0 : index
    %c0_0 = arith.constant 0 : index
    %0 = vector.load %arg1[%c0, %c0_0] : memref<8x32xbf16, #tpu.memory_space<vmem>>, vector<8x32xbf16>
    %c0_1 = arith.constant 0 : index
    %c0_2 = arith.constant 0 : index
    %1 = vector.load %arg2[%c0_1, %c0_2] : memref<32x128xbf16, #tpu.memory_space<vmem>>, vector<32x128xbf16>
    %cst = arith.constant dense<0.000000e+00> : vector<8x128xf32>
    %2 = tpu.matmul %0, %1, %cst {dimension_numbers = #tpu.dot_dimension_numbers<[1], [0], [0], [1], [0, 0, 1, 1], [], []>} : vector<8x32xbf16>, vector<32x128xbf16>, vector<8x128xf32> -> vector<8x128xf32>
    %c0_3 = arith.constant 0 : index
    %c0_4 = arith.constant 0 : index
    %3 = vector.load %arg3[%c0_3, %c0_4] : memref<1x128xf32, #tpu.memory_space<vmem>>, vector<1x128xf32>
    %4 = vector.broadcast %3 : vector<1x128xf32> to vector<8x128xf32>
    %5 = arith.addf %2, %4 : vector<8x128xf32>
    %cst_5 = arith.constant 0.000000e+00 : f32
    %6 = vector.broadcast %cst_5 : f32 to vector<8x128xf32>
    %7 = arith.maximumf %5, %6 : vector<8x128xf32>
    %8 = arith.truncf %7 : vector<8x128xf32> to vector<8x128xbf16>
    %c0_6 = arith.constant 0 : index
    %c0_7 = arith.constant 0 : index
    %9 = vector.load %arg4[%c0_6, %c0_7] : memref<128x64xbf16, #tpu.memory_space<vmem>>, vector<128x64xbf16>
    %cst_8 = arith.constant dense<0.000000e+00> : vector<8x64xf32>
    %10 = tpu.matmul %8, %9, %cst_8 {dimension_numbers = #tpu.dot_dimension_numbers<[1], [0], [0], [1], [0, 0, 1, 1], [], []>} : vector<8x128xbf16>, vector<128x64xbf16>, vector<8x64xf32> -> vector<8x64xf32>
    %c0_9 = arith.constant 0 : index
    %c0_10 = arith.constant 0 : index
    %11 = vector.load %arg5[%c0_9, %c0_10] : memref<1x64xf32, #tpu.memory_space<vmem>>, vector<1x64xf32>
    %12 = vector.broadcast %11 : vector<1x64xf32> to vector<8x64xf32>
    %13 = arith.addf %10, %12 : vector<8x64xf32>
    %cst_11 = arith.constant 0.000000e+00 : f32
    %14 = vector.broadcast %cst_11 : f32 to vector<8x64xf32>
    %15 = arith.maximumf %13, %14 : vector<8x64xf32>
    %16 = arith.truncf %15 : vector<8x64xf32> to vector<8x64xbf16>
    %c0_12 = arith.constant 0 : index
    %c0_13 = arith.constant 0 : index
    %17 = vector.load %arg6[%c0_12, %c0_13] : memref<64x2xbf16, #tpu.memory_space<vmem>>, vector<64x2xbf16>
    %cst_14 = arith.constant dense<0.000000e+00> : vector<8x2xf32>
    %18 = tpu.matmul %16, %17, %cst_14 {dimension_numbers = #tpu.dot_dimension_numbers<[1], [0], [0], [1], [0, 0, 1, 1], [], []>} : vector<8x64xbf16>, vector<64x2xbf16>, vector<8x2xf32> -> vector<8x2xf32>
    %c0_15 = arith.constant 0 : index
    %c0_16 = arith.constant 0 : index
    %19 = vector.load %arg7[%c0_15, %c0_16] : memref<1x2xf32, #tpu.memory_space<vmem>>, vector<1x2xf32>
    %20 = vector.broadcast %19 : vector<1x2xf32> to vector<8x2xf32>
    %21 = arith.addf %18, %20 : vector<8x2xf32>
    %22 = tpu.iota {dimensions = array<i32: 1>} : vector<8x2xi32>
    %c0_i32 = arith.constant 0 : i32
    %23 = vector.broadcast %c0_i32 : i32 to vector<8x2xi32>
    %24 = arith.cmpi eq, %22, %23 : vector<8x2xi32>
    %25 = arith.negf %21 : vector<8x2xf32>
    %26 = math.exp %25 : vector<8x2xf32>
    %cst_17 = arith.constant 1.000000e+00 : f32
    %27 = vector.broadcast %cst_17 : f32 to vector<8x2xf32>
    %28 = arith.addf %27, %26 : vector<8x2xf32>
    %29 = arith.divf %27, %28 : vector<8x2xf32>
    %30 = arith.select %24, %21, %29 : vector<8x2xi1>, vector<8x2xf32>
    %c0_18 = arith.constant 0 : index
    %c0_19 = arith.constant 0 : index
    %31 = vector.load %arg8[%c0_18, %c0_19] : memref<8x2xf32, #tpu.memory_space<vmem>>, vector<8x2xf32>
    tpu.vector_store %arg8[%c0_18, %c0_19], %30 {strides = array<i32>} : memref<8x2xf32, #tpu.memory_space<vmem>>, vector<8x2xf32>,
    return
  }
  func.func @transform_0(%arg0: i32) -> (i32, i32) {
    %c0_i32 = arith.constant 0 : i32
    %c0_i32_0 = arith.constant 0 : i32
    return %arg0, %c0_i32 : i32, i32
  }
  func.func @transform_1(%arg0: i32) -> (i32, i32) {
    %c0_i32 = arith.constant 0 : i32
    %c0_i32_0 = arith.constant 0 : i32
    %c0_i32_1 = arith.constant 0 : i32
    return %c0_i32, %c0_i32_0 : i32, i32
  }
  func.func @transform_2(%arg0: i32) -> (i32, i32) {
    %c0_i32 = arith.constant 0 : i32
    %c0_i32_0 = arith.constant 0 : i32
    %c0_i32_1 = arith.constant 0 : i32
    return %c0_i32, %c0_i32_0 : i32, i32
  }
  func.func @transform_3(%arg0: i32) -> (i32, i32) {
    %c0_i32 = arith.constant 0 : i32
    %c0_i32_0 = arith.constant 0 : i32
    %c0_i32_1 = arith.constant 0 : i32
    return %c0_i32, %c0_i32_0 : i32, i32
  }
  func.func @transform_4(%arg0: i32) -> (i32, i32) {
    %c0_i32 = arith.constant 0 : i32
    %c0_i32_0 = arith.constant 0 : i32
    %c0_i32_1 = arith.constant 0 : i32
    return %c0_i32, %c0_i32_0 : i32, i32
  }
  func.func @transform_5(%arg0: i32) -> (i32, i32) {
    %c0_i32 = arith.constant 0 : i32
    %c0_i32_0 = arith.constant 0 : i32
    %c0_i32_1 = arith.constant 0 : i32
    return %c0_i32, %c0_i32_0 : i32, i32
  }
  func.func @transform_6(%arg0: i32) -> (i32, i32) {
    %c0_i32 = arith.constant 0 : i32
    %c0_i32_0 = arith.constant 0 : i32
    %c0_i32_1 = arith.constant 0 : i32
    return %c0_i32, %c0_i32_0 : i32, i32
  }
  func.func @transform_7(%arg0: i32) -> (i32, i32) {
    %c0_i32 = arith.constant 0 : i32
    %c0_i32_0 = arith.constant 0 : i32
    return %arg0, %c0_i32 : i32, i32
  }
}

</mosaic_0001>

<bundles_post_ra>
// kernel: sentiment_rating_forward.1
= control target key start
LH: loop header
LB: loop body
LE: loop exit
PB: predicated region body
PF: predicated region fallthrough
CT: control target
= control target key end

     0   :  { %v406_v0 = vmov 0.0   ;;  %vm407_vm0 = vmmov 0   ;;  %vm51_vm1 = vcmask 261120   ;;  %vm249_vm2 = vcmask 523264   ;;  %s508_s1 = inlined_call_operand.vmem [shape: bf16[32,128], index: 1, kind: input, shape index: {}]   ;;  %s509_s3 = inlined_call_operand.vmem [shape: bf16[128,64], index: 3, kind: input, shape index: {}]   ;;  %s510_s0 = inlined_call_operand.vmem [shape: bf16[8,32], index: 0, kind: input, shape index: {}]   ;;  %s511_s5 = inlined_call_operand.vmem [shape: bf16[64,2], index: 5, kind: input, shape index: {}]   ;;  %s512_s2 = inlined_call_operand.vmem [shape: f32[1,128], index: 2, kind: input, shape index: {}]   ;;  %s513_s4 = inlined_call_operand.vmem [shape: f32[1,64], index: 4, kind: input, shape index: {}]   ;;  %s514_s6 = inlined_call_operand.vmem [shape: f32[1,2], index: 6, kind: input, shape index: {}]   ;;  %s515_s7 = inlined_call_operand.vmem [shape: f32[8,2], index: 7, kind: output, shape index: {}]  }
   0x1   :  { %346 = vmatprep.subr.bf16.mxu0 %v406_v0  ;;  %v388_v1 = vld [vmem:[%s508_s1] sm:$0xff]   ;;  %350 = vmatprep.mubr.msk.bf16.mxu0 %vm407_vm0, %v406_v0  ;;  %v389_v2 = vld [vmem:[%s508_s1 + $0x8] sm:$0xff]   ;;  %v392_v6 = vld [vmem:[%s509_s3 + $0x10] sm:$0xff]   ;;  %v293_v41 = vlaneseq  ;;  %vm303_vm4 = vcmask 15360  }
   0x2   :  { %354 = vmatprep.subr.bf16.mxu1 %v406_v0  ;;  %370 = vmatprep.mubr.msk.bf16.mxu1 %vm407_vm0, %v406_v0  ;;  %v390_v3 = vld [vmem:[%s509_s3] sm:$0xff]   ;;  %v391_v4 = vld [vmem:[%s509_s3 + $0x8] sm:$0xff]   ;;  %v393_v7 = vld [vmem:[%s509_s3 + $0x18] sm:$0xff]  }
   0x3   :  { %347 = vmatpush3.bf16.msra.mxu0 %v388_v1  ;;  %355 = vmatpush3.bf16.msra.mxu1 %v390_v3  ;;  %v27_v5 = vld [vmem:[%s510_s0] sm:$0xf]  ;;  %v395_v9 = vld [vmem:[%s509_s3 + $0x28] sm:$0xff]   ;;  %v396_v10 = vld [vmem:[%s509_s3 + $0x30] sm:$0xff]   ;;  %v294_v42 = vand.u32 127, %v293_v41 }
   0x4   :  { %348 = vmatprep.subr.bf16.mxu0 %v406_v0  ;;  %356 = vmatprep.subr.bf16.mxu1 %v406_v0  ;;  %v394_v8 = vld [vmem:[%s509_s3 + $0x20] sm:$0xff]   ;;  %v397_v11 = vld [vmem:[%s509_s3 + $0x38] sm:$0xff]   ;;  %v399_v13 = vld [vmem:[%s511_s5 + $0x8] sm:$0xff]  }
   0x5   :  { %v398_v12 = vld [vmem:[%s511_s5] sm:$0xff]   ;;  %v400_v22 = vld [vmem:[%s511_s5 + $0x10] sm:$0xff]   ;;  %v401_v23 = vld [vmem:[%s511_s5 + $0x18] sm:$0xff]   ;;  %vm295_vm3 = vcmp.eq.s32.totalorder %v294_v42, 0 }
   0x6   :  { %v309_v14 = vld [vmem:[%s512_s2] ss:$0 sm:$0xff] }
   0x7   :  { %349 = vmatpush3.bf16.msra.mxu0 %v389_v2  ;;  %357 = vmatpush3.bf16.msra.mxu1 %v391_v4  ;;  %v313_v24 = vld [vmem:[%s513_s4] ss:$0 sm:$0xff] }
   0x8   :  { %374 = vmatprep.subr.bf16.mxu0 %v406_v0  ;;  %358 = vmatprep.subr.bf16.mxu1 %v406_v0  ;;  %v322_v32 = vld [vmem:[%s514_s6] ss:$0 sm:$0xff] }
   0xa   :  { %351 = vmatmul.mubr.msk.bf16.vlgmr.msra.gmra.mrb[0].mxu0 %vm51_vm1, %v27_v5 }
   0xb   :  { %382 = vmatprep.mubr.msk.bf16.mxu0 %vm407_vm0, %v406_v0  ;;  %359 = vmatpush3.bf16.msra.mxu1 %v392_v6 }
   0xc   :  { %360 = vmatprep.subr.bf16.mxu1 %v406_v0  ;;  %375 = vmatpush3.bf16.msra.mxu0 %v398_v12 }
   0xd   :  { %376 = vmatprep.subr.bf16.mxu0 %v406_v0 }
   0xf   :  { %361 = vmatpush3.bf16.msra.mxu1 %v393_v7 }
  0x10   :  { %362 = vmatprep.subr.bf16.mxu1 %v406_v0  ;;  %377 = vmatpush3.bf16.msra.mxu0 %v399_v13 }
  0x11   :  { %378 = vmatprep.subr.bf16.mxu0 %v406_v0 }
  0x13   :  { %363 = vmatpush3.bf16.msra.mxu1 %v394_v8 }
  0x14   :  { %364 = vmatprep.subr.bf16.mxu1 %v406_v0  ;;  %379 = vmatpush3.bf16.msra.mxu0 %v400_v22 }
  0x15   :  { %380 = vmatprep.subr.bf16.mxu0 %v406_v0 }
  0x17   :  { %365 = vmatpush3.bf16.msra.mxu1 %v395_v9 }
  0x18   :  { %366 = vmatprep.subr.bf16.mxu1 %v406_v0  ;;  %381 = vmatpush3.bf16.msra.mxu0 %v401_v23 }
  0x1b   :  { %367 = vmatpush3.bf16.msra.mxu1 %v396_v10 }
  0x1c   :  { %368 = vmatprep.subr.bf16.mxu1 %v406_v0 }
  0x1f   :  { %369 = vmatpush3.bf16.msra.mxu1 %v397_v11 }
  0xdd   :  { %v89_v15 = vpop.f32.mrb[0].mxu0 }
  0xde   :  { %v90_v16 = vadd.f32 %v309_v14, %v89_v15  ;;  %v352_v17 = vpop.f32.mrb[1].mxu0 }
  0xdf   :  { %v92_v18 = vpop.f32.mrb[2].mxu0 }
  0xe0   :  { %v95_v19 = vmax.f32 %v90_v16, 0.0  ;;  %v353_v20 = vpop.f32.mrb[3].mxu0 }
  0xe2   :  { %v96_v21 = vpack.c.bf16 %v95_v19, %v95_v19 }
  0xe4   :  { %371 = vmatmul.mubr.bf16.vlgmr.msra.gmra.mrb[0].mxu1 %v96_v21 }
 0x1b7   :  { %v202_v25 = vpop.f32.mrb[0].mxu1 }
 0x1b8   :  { %v203_v26 = vadd.f32 %v313_v24, %v202_v25  ;;  %v372_v27 = vpop.f32.mrb[1].mxu1 }
 0x1b9   :  { %v205_v28 = vpop.f32.mrb[2].mxu1 }
 0x1ba   :  { %v208_v29 = vmax.f32 %v203_v26, 0.0  ;;  %v373_v30 = vpop.f32.mrb[3].mxu1 }
 0x1bc   :  { %v209_v31 = vpack.c.bf16 %v208_v29, %v208_v29 }
 0x1be   :  { %383 = vmatmul.mubr.msk.bf16.vlgmr.msra.gmra.mrb[4].mxu0 %vm249_vm2, %v209_v31 }
 0x291   :  { %v287_v33 = vpop.f32.mrb[4].mxu0 }
 0x292   :  { %v288_v34 = vadd.f32 %v322_v32, %v287_v33  ;;  %v384_v35 = vpop.f32.mrb[5].mxu0 }
 0x293   :  { %v290_v36 = vpop.f32.mrb[6].mxu0 }
 0x294   :  { %v328_v37 = vmul.f32 -1.442695, %v288_v34  ;;  %v385_v38 = vpop.f32.mrb[7].mxu0 }
 0x296   :  { %402 = vpow2.f32 %v328_v37 }
 0x2a0   :  { %v403_v39 = vpop.eup %402 }
 0x2a1   :  { %v299_v40 = vadd.f32 1.0, %v403_v39 }
 0x2a3   :  { %404 = vrcp.f32 %v299_v40 }
 0x2ad   :  { %v405_v43 = vpop.eup %404 }
 0x2ae   :  { %v302_v44 = vsel %vm295_vm3, %v288_v34, %v405_v43 }
 0x2af   :  { %304 = vst.msk [vmem:[%s515_s7] sm:$0xff] %vm303_vm4, %v302_v44 }

</bundles_post_ra>
